<compile_context>
chip_gen: v6e
topology: v6e:2x2x1
jax: 0.10.0
libtpu: 0.0.40
codegen_flags: <defaults>
</compile_context>

<pallas_src>
import jax
import jax.numpy as jnp
from jax.experimental import pallas as pl
from jax.experimental.pallas import tpu as pltpu


def mlp_dec_kernel(h_ref, w0_ref, b0_ref, w1_ref, b1_ref, y_ref):
    f32 = jnp.float32
    h = h_ref[...]                                   # (tile_n, in_dim)

    # dropout(h) -> identity (eval mode)
    z = jnp.dot(h, w0_ref[...], preferred_element_type=f32) + b0_ref[...]
    # F.leaky_relu(., negative_slope=0.02): max(x, 0.02*x) is exact for 0<slope<1
    z = jnp.maximum(z, 0.02 * z)
    # dropout(z) -> identity (eval mode)
    y = jnp.dot(z, w1_ref[...], preferred_element_type=f32) + b1_ref[...]

    y_ref[...] = y.astype(y_ref.dtype)


def mlp_dec_forward(h, w0, b0, w1, b1, *, tile_n=128):
    """Fused MLP_Dec forward.

    Args:
      h : [..., in_dim] input features.
      w0: [in_dim, hid_dim]   (== PyTorch linear0.weight.T)
      b0: [hid_dim]
      w1: [hid_dim, out_dim]  (== PyTorch linear1.weight.T)
      b1: [out_dim]
      tile_n: rows per grid step (multiple of 8).
    Returns:
      y : [..., out_dim]
    """
    assert tile_n % 8 == 0, "tile_n must be a multiple of 8 (sublane constraint)"

    lead_shape = h.shape[:-1]
    in_dim = h.shape[-1]
    hid_dim = w0.shape[1]
    out_dim = w1.shape[1]
    assert w0.shape == (in_dim, hid_dim)
    assert w1.shape == (hid_dim, out_dim)

    h2 = h.reshape(-1, in_dim).astype(jnp.float32)
    n = h2.shape[0]

    # pad N up to a multiple of tile_n so every grid tile is full
    n_pad = pl.cdiv(n, tile_n) * tile_n
    if n_pad != n:
        h2 = jnp.pad(h2, ((0, n_pad - n), (0, 0)))

    w0f = w0.astype(jnp.float32)
    w1f = w1.astype(jnp.float32)
    b0f = b0.astype(jnp.float32).reshape(1, hid_dim)
    b1f = b1.astype(jnp.float32).reshape(1, out_dim)

    grid = (n_pad // tile_n,)

    y = pl.pallas_call(
        mlp_dec_kernel,
        out_shape=jax.ShapeDtypeStruct((n_pad, out_dim), jnp.float32),
        grid=grid,
        in_specs=[
            # activations: tiled over N
            pl.BlockSpec((tile_n, in_dim), lambda i: (i, 0)),
            # weights / biases: resident (same block for every grid step)
            pl.BlockSpec((in_dim, hid_dim), lambda i: (0, 0)),
            pl.BlockSpec((1, hid_dim), lambda i: (0, 0)),
            pl.BlockSpec((hid_dim, out_dim), lambda i: (0, 0)),
            pl.BlockSpec((1, out_dim), lambda i: (0, 0)),
        ],
        out_specs=pl.BlockSpec((tile_n, out_dim), lambda i: (i, 0)),
        compiler_params=pltpu.CompilerParams(
            dimension_semantics=("parallel",)),
    )(h2, w0f, b0f, w1f, b1f)

    y = y[:n]
    return y.reshape(*lead_shape, out_dim)


def _reference(h, w0, b0, w1, b1):
    z = h.reshape(-1, h.shape[-1]).astype(jnp.float32) @ w0 + b0
    z = jnp.where(z >= 0, z, 0.02 * z)
    y = z @ w1 + b1
    return y.reshape(*h.shape[:-1], w1.shape[1])


if __name__ == "__main__":
    # small shapes consistent with MLP_Dec(in_dim, hid_dim, output_dim)
    N = 16
    in_dim = 24
    hid_dim = 32
    output_dim = 8

    key = jax.random.PRNGKey(0)
    kh, k0, kb0, k1, kb1 = jax.random.split(key, 5)

    h = jax.random.normal(kh, (N, in_dim), jnp.float32)
    w0 = jax.random.normal(k0, (in_dim, hid_dim), jnp.float32) / jnp.sqrt(
        jnp.float32(in_dim))
    b0 = jax.random.normal(kb0, (hid_dim,), jnp.float32) * 0.05
    w1 = jax.random.normal(k1, (hid_dim, output_dim), jnp.float32) / jnp.sqrt(
        jnp.float32(hid_dim))
    b1 = jax.random.normal(kb1, (output_dim,), jnp.float32) * 0.05

    # tile_n=8 -> grid of 2 tiles, exercises the N-tiled pipeline even at N=16
    y = mlp_dec_forward(h, w0, b0, w1, b1, tile_n=8)
    y = jax.block_until_ready(y)

    assert y.shape == (N, output_dim)

    y_ref = _reference(h, w0, b0, w1, b1)
    assert jnp.allclose(y, y_ref, atol=1e-5, rtol=1e-5), "mismatch vs reference"

    print("KERNEL_OK")
</pallas_src>

<mosaic_0001>
module attributes {stable_mosaic.version = 11 : i64} {
  func.func @mlp_dec_kernel(%arg0: i32, %arg1: memref<8x24xf32, #tpu.memory_space<vmem>>, %arg2: memref<24x32xf32, #tpu.memory_space<vmem>>, %arg3: memref<1x32xf32, #tpu.memory_space<vmem>>, %arg4: memref<32x8xf32, #tpu.memory_space<vmem>>, %arg5: memref<1x8xf32, #tpu.memory_space<vmem>>, %arg6: memref<8x8xf32, #tpu.memory_space<vmem>>) attributes {dimension_semantics = [#tpu.dimension_semantics<parallel>], iteration_bounds = array<i64: 2>, scalar_prefetch = 0 : i64, scratch_operands = 0 : i64, tpu.core_type = #tpu.core_type<tc>, window_params = [{transform_indices = @transform_0, window_bounds = array<i64: 8, 24>}, {pipeline_mode = #tpu.pipeline_mode<synchronous>, transform_indices = @transform_1, window_bounds = array<i64: 24, 32>}, {pipeline_mode = #tpu.pipeline_mode<synchronous>, transform_indices = @transform_2, window_bounds = array<i64: 1, 32>}, {pipeline_mode = #tpu.pipeline_mode<synchronous>, transform_indices = @transform_3, window_bounds = array<i64: 32, 8>}, {pipeline_mode = #tpu.pipeline_mode<synchronous>, transform_indices = @transform_4, window_bounds = array<i64: 1, 8>}, {transform_indices = @transform_5, window_bounds = array<i64: 8, 8>}]} {
    %c0 = arith.constant 0 : index
    %c0_0 = arith.constant 0 : index
    %0 = vector.load %arg1[%c0, %c0_0] : memref<8x24xf32, #tpu.memory_space<vmem>>, vector<8x24xf32>
    %c0_1 = arith.constant 0 : index
    %c0_2 = arith.constant 0 : index
    %1 = vector.load %arg2[%c0_1, %c0_2] : memref<24x32xf32, #tpu.memory_space<vmem>>, vector<24x32xf32>
    %cst = arith.constant dense<0.000000e+00> : vector<8x32xf32>
    %2 = tpu.matmul %0, %1, %cst {dimension_numbers = #tpu.dot_dimension_numbers<[1], [0], [0], [1], [0, 0, 1, 1], [], []>} : vector<8x24xf32>, vector<24x32xf32>, vector<8x32xf32> -> vector<8x32xf32>
    %c0_3 = arith.constant 0 : index
    %c0_4 = arith.constant 0 : index
    %3 = vector.load %arg3[%c0_3, %c0_4] : memref<1x32xf32, #tpu.memory_space<vmem>>, vector<1x32xf32>
    %4 = vector.broadcast %3 : vector<1x32xf32> to vector<8x32xf32>
    %5 = arith.addf %2, %4 : vector<8x32xf32>
    %cst_5 = arith.constant 2.000000e-02 : f32
    %6 = vector.broadcast %cst_5 : f32 to vector<8x32xf32>
    %7 = arith.mulf %6, %5 : vector<8x32xf32>
    %8 = arith.maximumf %5, %7 : vector<8x32xf32>
    %c0_6 = arith.constant 0 : index
    %c0_7 = arith.constant 0 : index
    %9 = vector.load %arg4[%c0_6, %c0_7] : memref<32x8xf32, #tpu.memory_space<vmem>>, vector<32x8xf32>
    %cst_8 = arith.constant dense<0.000000e+00> : vector<8x8xf32>
    %10 = tpu.matmul %8, %9, %cst_8 {dimension_numbers = #tpu.dot_dimension_numbers<[1], [0], [0], [1], [0, 0, 1, 1], [], []>} : vector<8x32xf32>, vector<32x8xf32>, vector<8x8xf32> -> vector<8x8xf32>
    %c0_9 = arith.constant 0 : index
    %c0_10 = arith.constant 0 : index
    %11 = vector.load %arg5[%c0_9, %c0_10] : memref<1x8xf32, #tpu.memory_space<vmem>>, vector<1x8xf32>
    %12 = vector.broadcast %11 : vector<1x8xf32> to vector<8x8xf32>
    %13 = arith.addf %10, %12 : vector<8x8xf32>
    %c0_11 = arith.constant 0 : index
    %c0_12 = arith.constant 0 : index
    %14 = vector.load %arg6[%c0_11, %c0_12] : memref<8x8xf32, #tpu.memory_space<vmem>>, vector<8x8xf32>
    tpu.vector_store %arg6[%c0_11, %c0_12], %13 {strides = array<i32>} : memref<8x8xf32, #tpu.memory_space<vmem>>, vector<8x8xf32>,
    return
  }
  func.func @transform_0(%arg0: i32) -> (i32, i32) {
    %c0_i32 = arith.constant 0 : i32
    %c0_i32_0 = arith.constant 0 : i32
    return %arg0, %c0_i32 : i32, i32
  }
  func.func @transform_1(%arg0: i32) -> (i32, i32) {
    %c0_i32 = arith.constant 0 : i32
    %c0_i32_0 = arith.constant 0 : i32
    %c0_i32_1 = arith.constant 0 : i32
    return %c0_i32, %c0_i32_0 : i32, i32
  }
  func.func @transform_2(%arg0: i32) -> (i32, i32) {
    %c0_i32 = arith.constant 0 : i32
    %c0_i32_0 = arith.constant 0 : i32
    %c0_i32_1 = arith.constant 0 : i32
    return %c0_i32, %c0_i32_0 : i32, i32
  }
  func.func @transform_3(%arg0: i32) -> (i32, i32) {
    %c0_i32 = arith.constant 0 : i32
    %c0_i32_0 = arith.constant 0 : i32
    %c0_i32_1 = arith.constant 0 : i32
    return %c0_i32, %c0_i32_0 : i32, i32
  }
  func.func @transform_4(%arg0: i32) -> (i32, i32) {
    %c0_i32 = arith.constant 0 : i32
    %c0_i32_0 = arith.constant 0 : i32
    %c0_i32_1 = arith.constant 0 : i32
    return %c0_i32, %c0_i32_0 : i32, i32
  }
  func.func @transform_5(%arg0: i32) -> (i32, i32) {
    %c0_i32 = arith.constant 0 : i32
    %c0_i32_0 = arith.constant 0 : i32
    return %arg0, %c0_i32 : i32, i32
  }
}

</mosaic_0001>

<bundles_post_ra>
// kernel: tpu_custom_call.1
= control target key start
LH: loop header
LB: loop body
LE: loop exit
PB: predicated region body
PF: predicated region fallthrough
CT: control target
= control target key end

     0   :  { %s539_s18 = smov 0   ;;  %s586_s0 = inlined_call_operand.vmem [shape: f32[16,24], index: 0, kind: input, shape index: {}]   ;;  %s587_s1 = inlined_call_operand.vmem [shape: f32[24,32], index: 1, kind: input, shape index: {}]   ;;  %s588_s2 = inlined_call_operand.vmem [shape: f32[1,32], index: 2, kind: input, shape index: {}]   ;;  %s589_s3 = inlined_call_operand.vmem [shape: f32[32,8], index: 3, kind: input, shape index: {}]   ;;  %s590_s4 = inlined_call_operand.vmem [shape: f32[1,8], index: 4, kind: input, shape index: {}]   ;;  %s591_s5 = inlined_call_operand.vmem [shape: f32[16,8], index: 5, kind: output, shape index: {}]  }
   0x1 LB: > { %s447_s19 = sadd.s32 4294967295, %s505_s18   ;;  %p451_p0 = scmp.ge.s32.totalorder %s505_s18, 1  ;;  %s505_s18 = sphi %s539_s18, %s15_s18  }
   0x2   : > { %p186_p1 = scmp.lt.s32.totalorder %s505_s18, 3 }
   0x4   : > { %p187_p2 = pnand %p451_p0, %p186_p1 }
   0x5   : > { %p212_p3 = scmp.lt.s32.totalorder (!%p187_p2), %s447_s19, 1 }
   0x6   : > { %190 = sbr.rel (%p187_p2) target bundleno = 413 (0x19d), region = 40 }
   0xb   : > { %v223_v0 = vld [vmem:[%s587_s1 + $0x10] sm:$0xff]  ;;  %v507_v1 = vmov 0.0   ;;  %v222_v2 = vld [vmem:[%s587_s1 + $0x8] sm:$0xff]  ;;  %vm508_vm0 = vmmov 0   ;;  %s593_s19 = smov (!%p212_p3, %s447_s19), 1  ;;  %v221_v3 = vld [vmem:[%s587_s1] sm:$0xff] }
   0xc   : > { %469 = vmatprep.subr.mxu0 %v507_v1  ;;  %475 = vmatprep.mubr.msk.f32.mxu0 %vm508_vm0, %v507_v1  ;;  %s452_s26 = sshll.u32 %s593_s19, 3  ;;  %vm231_vm1 = vcmask 195584   ;;  %v310_v5 = vld [vmem:[%s589_s3 + $0x18] sm:$0xff]  ;;  %v309_v6 = vld [vmem:[%s589_s3 + $0x10] sm:$0xff]  ;;  %v308_v7 = vld [vmem:[%s589_s3 + $0x8] sm:$0xff]  ;;  %vm318_vm2 = vcmask 261120  }
   0xd   : > { %470 = vmatpush3.msra.mxu0 %v223_v0  ;;  %478 = vmatprep.subr.mxu1 %v507_v1  ;;  %s215_s29 = scalar_lea.vmem %s586_s0, %s452_s26  ;;  %v307_v8 = vld [vmem:[%s589_s3] sm:$0xff]  ;;  %s219_s20 = scalar_lea.vmem %s591_s5, %s452_s26  ;;  %vm392_vm3 = vcmask 64512  }
   0xe   : > { %471 = vmatprep.subr.mxu0 %v507_v1  ;;  %486 = vmatprep.mubr.msk.f32.mxu1 %vm508_vm0, %v507_v1  ;;  %v220_v4 = vld [vmem:[%s215_s29] sm:$0xff] }
   0xf   : > { %472 = vmatpush3.msra.mxu0 %v222_v2  ;;  %479 = vmatpush3.msra.mxu1 %v310_v5  ;;  %v454_v9 = vld [vmem:[%s588_s2] ss:$0 sm:$0xff] }
  0x10   : > { %473 = vmatprep.subr.mxu0 %v507_v1  ;;  %480 = vmatprep.subr.mxu1 %v507_v1  ;;  %v456_v15 = vld [vmem:[%s590_s4] ss:$0 sm:$0xff] }
  0x11   : > { %474 = vmatpush3.msra.mxu0 %v221_v3  ;;  %481 = vmatpush3.msra.mxu1 %v309_v6 }
  0x12   : > { %476 = vmatmul.mubr.msk.f32.vlgmr.msra.gmra.mxu0 %vm231_vm1, %v220_v4  ;;  %482 = vmatprep.subr.mxu1 %v507_v1 }
  0x13   : > { %483 = vmatpush3.msra.mxu1 %v308_v7 }
  0x14   : > { %484 = vmatprep.subr.mxu1 %v507_v1 }
  0x15   : > { %485 = vmatpush3.msra.mxu1 %v307_v8 }
  0xd2   : > { %v301_v10 = vpop.f32.mrf.mxu0 }
  0xd3   : > { %v302_v11 = vadd.f32 %v454_v9, %v301_v10 }
  0xd4   : > { %v477_v12 = vpop.f32.mrf.mxu0 }
  0xd5   : > { %v305_v13 = vmul.f32 0.02, %v302_v11 }
  0xd7   : > { %v306_v14 = vmax.f32 %v302_v11, %v305_v13 }
  0xd9   : > { %487 = vmatmul.mubr.msk.f32.vlgmr.msra.gmra.mxu1 %vm318_vm2, %v306_v14 }
 0x199   : > { %v388_v16 = vpop.f32.mrf.mxu1 }
 0x19a   : > { %v389_v17 = vadd.f32 %v456_v15, %v388_v16 }
 0x19b   : > { %v488_v18 = vpop.f32.mrf.mxu1 }
 0x19c   : > { %393 = vst.msk [vmem:[%s219_s20] sm:$0xff] %vm392_vm3, %v389_v17 }
 0x19d PF: > { %s15_s18 = sadd.s32 1, %s505_s18  }
 0x19e   : > { %p12_p4 = scmp.ge.s32.totalorder %s15_s18, 4  }
 0x1a0   :  { %14 = sbr.rel (!%p12_p4) target bundleno = 1 (0x1), region = 70 }

</bundles_post_ra>
